<compile_context>
chip_gen: v5e
topology: v5e:2x2
jax: 0.10.0
libtpu: 0.0.40
codegen_flags: <defaults>
</compile_context>

<pallas_src>
import math

import jax
import jax.numpy as jnp
from jax.experimental import pallas as pl
from jax.experimental.pallas import tpu as pltpu

_LANE = 128


def _copy_kernel(x_ref, o_ref):
    # Identity copy of the current (row_tile, W) tile.
    o_ref[...] = x_ref[...]


def _sublane_multiple(dtype) -> int:
    # Sub-32-bit dtypes pack along sublanes: f32 -> 8, bf16/f16 -> 16,
    # int8/fp8 -> 32.
    itemsize = jnp.dtype(dtype).itemsize
    return max(8, 32 // max(itemsize, 1))


def reshape_forward(x, outer_shape, *, target_tile_bytes=2 * 1024 * 1024):
    """Pallas equivalent of `x.view(x.size(0), *outer_shape)`.

    x: array of shape (B, ...) in row-major (NCHW-style) layout.
    outer_shape: tuple of ints; prod(outer_shape) must equal prod(x.shape[1:]).
    """
    b = x.shape[0]
    feat = int(math.prod(x.shape[1:]))
    tgt = int(math.prod(outer_shape))
    if feat != tgt:
        raise ValueError(
            f"cannot view {x.shape} as ({b}, {tuple(outer_shape)}): "
            f"{feat} != {tgt}")
    out_shape = (b,) + tuple(outer_shape)

    dtype = x.dtype
    itemsize = jnp.dtype(dtype).itemsize
    sub = _sublane_multiple(dtype)
    total = b * feat

    # Tiny input: a materialized copy kernel buys nothing and padding would
    # dominate.  Reshape is metadata-only anyway.
    if total < sub * _LANE:
        return x.reshape(out_shape)

    # ------------------------------------------------------------------
    # Retile the contiguous row-major data as a lane-dense (rows, W) slab.
    #   W    : multiple of 128; prefer the widest candidate that divides
    #          `total` exactly (no padding, all stores unmasked).
    #   rows : padded up to a multiple of the dtype-aware sublane multiple
    #          so the block's last-2 dims satisfy the (8, 128) constraint.
    #   rt   : row tile giving ~target_tile_bytes per tile.
    # ------------------------------------------------------------------
    W = _LANE
    for w in (4096, 2048, 1024, 512, 256):
        if total % (w * sub) == 0:
            W = w
            break

    rows = ((pl.cdiv(total, W) + sub - 1) // sub) * sub
    padded = rows * W

    flat = x.reshape(total)
    if padded != total:
        flat = jnp.pad(flat, (0, padded - total))
    slab = flat.reshape(rows, W)

    rt = (target_tile_bytes // (W * itemsize)) // sub * sub
    rt = int(max(sub, min(rt, rows)))          # multiple of `sub`, <= rows
    grid = (pl.cdiv(rows, rt),)                # ragged last tile is masked

    out_slab = pl.pallas_call(
        _copy_kernel,
        out_shape=jax.ShapeDtypeStruct((rows, W), dtype),
        grid_spec=pltpu.PrefetchScalarGridSpec(
            num_scalar_prefetch=0,
            grid=grid,
            in_specs=[pl.BlockSpec((rt, W), lambda i: (i, 0))],
            out_specs=pl.BlockSpec((rt, W), lambda i: (i, 0)),
        ),
        compiler_params=pltpu.CompilerParams(
            dimension_semantics=("parallel",),
            vmem_limit_bytes=32 * 1024 * 1024,
        ),
        # In-place identity copy: avoids a second (rows, W) HBM allocation
        # whenever the input buffer is donatable (e.g. under jit+donation).
        input_output_aliases={0: 0},
    )(slab)

    out_flat = out_slab.reshape(padded)
    if padded != total:
        out_flat = out_flat[:total]
    return out_flat.reshape(out_shape)


if __name__ == "__main__":
    key = jax.random.PRNGKey(0)

    # NCHW input (B=2, C=4, H=16, W=16), viewed as (B, 16, 64).
    x = jax.random.normal(key, (2, 4, 16, 16), dtype=jnp.float32)
    outer_shape = (16, 64)

    # Reference first (plain JAX reshape == torch .view semantics here).
    y_ref = x.reshape((x.shape[0],) + outer_shape)

    y = reshape_forward(x, outer_shape)
    y = jax.block_until_ready(y)

    assert y.shape == (2, 16, 64), y.shape
    assert y.dtype == x.dtype
    assert bool(jnp.array_equal(y, y_ref))

    print("KERNEL_OK")
</pallas_src>

<mosaic_0001>
module attributes {stable_mosaic.version = 11 : i64} {
  func.func @_copy_kernel(%arg0: i32, %arg1: memref<8x256xf32, #tpu.memory_space<vmem>>, %arg2: memref<8x256xf32, #tpu.memory_space<vmem>>) attributes {dimension_semantics = [#tpu.dimension_semantics<parallel>], iteration_bounds = array<i64: 1>, scalar_prefetch = 0 : i64, scratch_operands = 0 : i64, tpu.core_type = #tpu.core_type<tc>, window_params = [{transform_indices = @transform_0, window_bounds = array<i64: 8, 256>}, {transform_indices = @transform_1, window_bounds = array<i64: 8, 256>}]} {
    %c0 = arith.constant 0 : index
    %c0_0 = arith.constant 0 : index
    %0 = vector.load %arg1[%c0, %c0_0] : memref<8x256xf32, #tpu.memory_space<vmem>>, vector<8x256xf32>
    %c0_1 = arith.constant 0 : index
    %c0_2 = arith.constant 0 : index
    %1 = vector.load %arg2[%c0_1, %c0_2] : memref<8x256xf32, #tpu.memory_space<vmem>>, vector<8x256xf32>
    tpu.vector_store %arg2[%c0_1, %c0_2], %0 {strides = array<i32>} : memref<8x256xf32, #tpu.memory_space<vmem>>, vector<8x256xf32>,
    return
  }
  func.func @transform_0(%arg0: i32) -> (i32, i32) {
    %c0_i32 = arith.constant 0 : i32
    %c0_i32_0 = arith.constant 0 : i32
    return %arg0, %c0_i32 : i32, i32
  }
  func.func @transform_1(%arg0: i32) -> (i32, i32) {
    %c0_i32 = arith.constant 0 : i32
    %c0_i32_0 = arith.constant 0 : i32
    return %arg0, %c0_i32 : i32, i32
  }
}

</mosaic_0001>

<bundles_post_ra>
// kernel: tpu_custom_call.1
= control target key start
LH: loop header
LB: loop body
LE: loop exit
PB: predicated region body
PF: predicated region fallthrough
CT: control target
= control target key end

     0   :  { %6 = vsyncpa [#allocation3], 0  ;;  %s116_s0 = inlined_call_operand.hbm [shape: f32[8,256], index: 0, kind: input, shape index: {}, may-alias: {0,1}]   ;;  %s117_s1 = inlined_call_operand.hbm [shape: f32[8,256], index: 1, kind: output, shape index: {}, may-alias: {0,1}]  }
   0x1   :  { %7 = vsyncpa [#allocation4], 0  ;;  %s13_s8 = sshll.u32 %s116_s0, 4  ;;  %s98_s9 = smov [#allocation2]   ;;  %s14_s8 = int_to_ptr.hbm [resolvable:$true] %s13_s8 }
   0x2   :  { %s15_s10 = sshll.u32 %s98_s9, 4  ;;  %s16_s10 = int_to_ptr.vmem [resolvable:$true] %s15_s10 }
   0x3   :  { %18 = dma.hbm_to_vmem [thread:$0]  %s14_s8, 256, %s16_s10, [#allocation3]  }
   0x4   :  { %94 = dma.done.wait [#allocation3], 256  }
   0x5   :  { %95 = vsyncadd [#allocation3], 4294967040  ;;  %s99_s11 = smov [#allocation5]   ;;  %s34_s15 = sshll.u32 %s117_s1, 4  ;;  %v23_v0 = vld [vmem:[#allocation2] sm:$0xff]  ;;  %v24_v1 = vld [vmem:[#allocation2 + $0x8] sm:$0xff]  ;;  %s35_s15 = int_to_ptr.hbm [resolvable:$true] %s34_s15 }
   0x6   :  { %s32_s12 = sshll.u32 %s99_s11, 4  ;;  %25 = vst [vmem:[#allocation5] sm:$0xff] %v23_v0  ;;  %s33_s12 = int_to_ptr.vmem [resolvable:$true] %s32_s12 }
   0x7   :  { %26 = vst [vmem:[#allocation5 + $0x8] sm:$0xff] %v24_v1 }
   0x8   :  { %37 = dma.vmem_to_hbm [thread:$0]  %s33_s12, 256, %s35_s15, [#allocation4]  }
   0x9   :  { %96 = dma.done.wait [#allocation4], 256  }
   0xa   :  { %97 = vsyncadd [#allocation4], 4294967040 }
   0xb   :  { %42 = vsyncpa [#allocation3], 1 }
   0xc   :  { %43 = vsyncpa [#allocation4], 1 }

</bundles_post_ra>
